<compile_context>
chip_gen: v7x
topology: tpu7x:2x2x1
jax: 0.10.0
libtpu: 0.0.40
codegen_flags: <defaults>
</compile_context>

<pallas_src>
import jax
import jax.numpy as jnp
from jax.experimental import pallas as pl
from jax.experimental.pallas import tpu as pltpu


def _triplet_kernel(margin, batch_size, tb):
    def kernel(a_ref, p_ref, n_ref, o_ref):
        a = a_ref[...].astype(jnp.float32)
        p = p_ref[...].astype(jnp.float32)
        n = n_ref[...].astype(jnp.float32)

        dp = a - p
        dn = a - n
        # Fused: one elementwise difference-of-squares, one cross-lane reduction
        # (instead of two separate axis=1 sums).
        s = dp * dp - dn * dn
        d = jnp.sum(s, axis=1, keepdims=True)                    # (TB, 1)
        losses = jnp.maximum(d + jnp.float32(margin), 0.0)       # (TB, 1)

        # Mask padded tail rows of the last block (B may not divide TB).
        row = pl.program_id(0) * tb + jax.lax.broadcasted_iota(jnp.int32, (tb, 1), 0)
        losses = jnp.where(row < batch_size, losses, 0.0)

        block_sum = jnp.sum(losses)
        # Lane-dense per-block partial-sum tile; wrapper reads element [i, 0, 0].
        o_ref[...] = jnp.full(o_ref.shape, block_sum, dtype=jnp.float32)

    return kernel


def _choose_block_rows(batch, feat, itemsize, target_block_bytes=2 * 1024 * 1024):
    """Largest multiple-of-8 row tile with ~target_block_bytes per input block."""
    tb = (target_block_bytes // max(feat * itemsize, 1)) // 8 * 8
    b_pad = ((batch + 7) // 8) * 8
    tb = min(max(tb, 8), b_pad)
    return int(tb)


def triplet_loss(anchor, positive, negative, margin=1.0, block_rows=None):
    assert anchor.shape == positive.shape == negative.shape
    B, D = anchor.shape
    itemsize = jnp.dtype(anchor.dtype).itemsize

    tb = _choose_block_rows(B, D, itemsize) if block_rows is None else int(block_rows)
    assert tb % 8 == 0
    grid = -(-B // tb)  # ceil-div

    partials = pl.pallas_call(
        _triplet_kernel(margin, B, tb),
        out_shape=jax.ShapeDtypeStruct((grid, 8, 128), jnp.float32),
        grid=(grid,),
        in_specs=[
            pl.BlockSpec((tb, D), lambda i: (i, 0)),
            pl.BlockSpec((tb, D), lambda i: (i, 0)),
            pl.BlockSpec((tb, D), lambda i: (i, 0)),
        ],
        out_specs=pl.BlockSpec((1, 8, 128), lambda i: (i, 0, 0)),
        compiler_params=pltpu.CompilerParams(
            # Per-block partial sums -> grid axis is embarrassingly parallel
            # (allows 2-TC sharding on v7x instead of a serial accumulator).
            dimension_semantics=("parallel",),
            # ~12 MiB of double-buffered input blocks + f32 intermediates;
            # 48 MiB leaves headroom under v7x's 64 MiB physical VMEM and
            # raises v5e's 16 MiB default scoped limit.
            vmem_limit_bytes=48 * 1024 * 1024,
        ),
    )(anchor, positive, negative)

    # Tiny final reduction; divide by the true batch size (not padded size).
    return jnp.sum(partials[:, 0, 0]) / jnp.float32(B)


def triplet_loss_ref(anchor, positive, negative, margin=1.0):
    a = anchor.astype(jnp.float32)
    p = positive.astype(jnp.float32)
    n = negative.astype(jnp.float32)
    pos_d = jnp.sum((a - p) ** 2, axis=1)
    neg_d = jnp.sum((a - n) ** 2, axis=1)
    return jnp.mean(jnp.maximum(pos_d - neg_d + margin, 0.0))


if __name__ == "__main__":
    # Test 1: small shape consistent with the module (batch=8, embedding_dim=32).
    k1, k2, k3 = jax.random.split(jax.random.PRNGKey(0), 3)
    B, D = 8, 32
    anchor = jax.random.normal(k1, (B, D), dtype=jnp.float32)
    positive = jax.random.normal(k2, (B, D), dtype=jnp.float32)
    negative = jax.random.normal(k3, (B, D), dtype=jnp.float32)

    out = triplet_loss(anchor, positive, negative, margin=1.0)
    jax.block_until_ready(out)
    ref = triplet_loss_ref(anchor, positive, negative, margin=1.0)
    assert jnp.allclose(out, ref, rtol=1e-5, atol=1e-5), (out, ref)

    # Test 2: multi-block grid with a ragged tail (B=50, block_rows=16) to exercise
    # tail-row masking, per-block partials, and the wrapper-side reduction.
    k4, k5, k6 = jax.random.split(jax.random.PRNGKey(1), 3)
    B2, D2 = 50, 32
    a2 = jax.random.normal(k4, (B2, D2), dtype=jnp.float32)
    p2 = jax.random.normal(k5, (B2, D2), dtype=jnp.float32)
    n2 = jax.random.normal(k6, (B2, D2), dtype=jnp.float32)

    out2 = triplet_loss(a2, p2, n2, margin=1.0, block_rows=16)
    jax.block_until_ready(out2)
    ref2 = triplet_loss_ref(a2, p2, n2, margin=1.0)
    assert jnp.allclose(out2, ref2, rtol=1e-5, atol=1e-5), (out2, ref2)

    print("KERNEL_OK")
</pallas_src>

<mosaic_0001>
module attributes {stable_mosaic.version = 11 : i64} {
  func.func @kernel(%arg0: i32, %arg1: memref<8x32xf32, #tpu.memory_space<vmem>>, %arg2: memref<8x32xf32, #tpu.memory_space<vmem>>, %arg3: memref<8x32xf32, #tpu.memory_space<vmem>>, %arg4: memref<1x8x128xf32, #tpu.memory_space<vmem>>) attributes {dimension_semantics = [#tpu.dimension_semantics<parallel>], iteration_bounds = array<i64: 1>, scalar_prefetch = 0 : i64, scratch_operands = 0 : i64, tpu.core_type = #tpu.core_type<tc>, window_params = [{transform_indices = @transform_0, window_bounds = array<i64: 8, 32>}, {transform_indices = @transform_1, window_bounds = array<i64: 8, 32>}, {transform_indices = @transform_2, window_bounds = array<i64: 8, 32>}, {transform_indices = @transform_3, window_bounds = array<i64: 1, 8, 128>}]} {
    %c0 = arith.constant 0 : index
    %c0_0 = arith.constant 0 : index
    %0 = vector.load %arg1[%c0, %c0_0] : memref<8x32xf32, #tpu.memory_space<vmem>>, vector<8x32xf32>
    %c0_1 = arith.constant 0 : index
    %c0_2 = arith.constant 0 : index
    %1 = vector.load %arg2[%c0_1, %c0_2] : memref<8x32xf32, #tpu.memory_space<vmem>>, vector<8x32xf32>
    %c0_3 = arith.constant 0 : index
    %c0_4 = arith.constant 0 : index
    %2 = vector.load %arg3[%c0_3, %c0_4] : memref<8x32xf32, #tpu.memory_space<vmem>>, vector<8x32xf32>
    %3 = arith.subf %0, %1 : vector<8x32xf32>
    %4 = arith.subf %0, %2 : vector<8x32xf32>
    %5 = arith.mulf %3, %3 : vector<8x32xf32>
    %6 = arith.mulf %4, %4 : vector<8x32xf32>
    %7 = arith.subf %5, %6 : vector<8x32xf32>
    %cst = arith.constant dense<0.000000e+00> : vector<8xf32>
    %8 = vector.multi_reduction <add>, %7, %cst [1] : vector<8x32xf32> to vector<8xf32>
    %9 = vector.shape_cast %8 : vector<8xf32> to vector<8x1xf32>
    %cst_5 = arith.constant 1.000000e+00 : f32
    %10 = vector.broadcast %cst_5 : f32 to vector<8x1xf32>
    %11 = arith.addf %9, %10 : vector<8x1xf32>
    %cst_6 = arith.constant 0.000000e+00 : f32
    %12 = vector.broadcast %cst_6 : f32 to vector<8x1xf32>
    %13 = arith.maximumf %11, %12 : vector<8x1xf32>
    %c8_i32 = arith.constant 8 : i32
    %14 = arith.muli %arg0, %c8_i32 : i32
    %15 = tpu.iota {dimensions = array<i32: 0>} : vector<8x1xi32>
    %16 = vector.broadcast %14 : i32 to vector<8x1xi32>
    %17 = arith.addi %16, %15 : vector<8x1xi32>
    %c8_i32_7 = arith.constant 8 : i32
    %18 = vector.broadcast %c8_i32_7 : i32 to vector<8x1xi32>
    %19 = arith.cmpi slt, %17, %18 : vector<8x1xi32>
    %cst_8 = arith.constant 0.000000e+00 : f32
    %20 = vector.broadcast %cst_8 : f32 to vector<8x1xf32>
    %21 = arith.select %19, %13, %20 : vector<8x1xi1>, vector<8x1xf32>
    %22 = vector.shape_cast %21 : vector<8x1xf32> to vector<1x8x1xf32>
    %cst_9 = arith.constant dense<0.000000e+00> : vector<1xf32>
    %23 = vector.multi_reduction <add>, %22, %cst_9 [1, 2] : vector<1x8x1xf32> to vector<1xf32>
    %24 = vector.shape_cast %23 : vector<1xf32> to vector<1x1x1xf32>
    %25 = vector.extract %24[0, 0, 0] : f32 from vector<1x1x1xf32>
    %26 = vector.broadcast %25 : f32 to vector<1x8x128xf32>
    %c0_10 = arith.constant 0 : index
    %c0_11 = arith.constant 0 : index
    %c0_12 = arith.constant 0 : index
    %27 = vector.load %arg4[%c0_10, %c0_11, %c0_12] : memref<1x8x128xf32, #tpu.memory_space<vmem>>, vector<1x8x128xf32>
    tpu.vector_store %arg4[%c0_10, %c0_11, %c0_12], %26 {strides = array<i32>} : memref<1x8x128xf32, #tpu.memory_space<vmem>>, vector<1x8x128xf32>,
    return
  }
  func.func @transform_0(%arg0: i32) -> (i32, i32) {
    %c0_i32 = arith.constant 0 : i32
    %c0_i32_0 = arith.constant 0 : i32
    return %arg0, %c0_i32 : i32, i32
  }
  func.func @transform_1(%arg0: i32) -> (i32, i32) {
    %c0_i32 = arith.constant 0 : i32
    %c0_i32_0 = arith.constant 0 : i32
    return %arg0, %c0_i32 : i32, i32
  }
  func.func @transform_2(%arg0: i32) -> (i32, i32) {
    %c0_i32 = arith.constant 0 : i32
    %c0_i32_0 = arith.constant 0 : i32
    return %arg0, %c0_i32 : i32, i32
  }
  func.func @transform_3(%arg0: i32) -> (i32, i32, i32) {
    %c0_i32 = arith.constant 0 : i32
    %c0_i32_0 = arith.constant 0 : i32
    %c0_i32_1 = arith.constant 0 : i32
    return %arg0, %c0_i32, %c0_i32_0 : i32, i32, i32
  }
}

</mosaic_0001>

<bundles_post_ra>
// kernel: tpu_custom_call.1
= control target key start
LH: loop header
LB: loop body
LE: loop exit
PB: predicated region body
PF: predicated region fallthrough
CT: control target
= control target key end

     0   :  { %8 = vsyncpa [#allocation3], 0  ;;  %s272_s0 = inlined_call_operand.hbm [shape: f32[8,32], index: 0, kind: input, shape index: {}]   ;;  %s273_s1 = inlined_call_operand.hbm [shape: f32[8,32], index: 1, kind: input, shape index: {}]   ;;  %s274_s2 = inlined_call_operand.hbm [shape: f32[8,32], index: 2, kind: input, shape index: {}]   ;;  %s275_s3 = inlined_call_operand.hbm [shape: f32[1,8,128], index: 3, kind: output, shape index: {}]  }
   0x1   :  { %9 = vsyncpa [#allocation6], 0 }
   0x2   :  { %10 = vsyncpa [#allocation4], 0  ;;  %s200_s12 = smov [#allocation5]   ;;  %s201_s14 = smov [#allocation2]  }
   0x3   :  { %s27_s13 = sshll.u32 %s200_s12, 4  ;;  %s17_s15 = sshll.u32 %s201_s14, 4  ;;  %s28_s13 = int_to_ptr.vmem [resolvable:$true] %s27_s13  ;;  %s18_s15 = int_to_ptr.vmem [resolvable:$true] %s17_s15 }
   0x4   :  { %s106_s18 = scalar_lea.hbm %s273_s1, 128 }
   0x5   :  { %p107_p0 = scmp.ne.s32.totalorder %s273_s1, %s106_s18  ;;  %p110_p1 = scmp.lt.u32.totalorder %s106_s18, %s273_s1 }
   0x7   :  { %p112_p2 = pnand %p110_p1, %p107_p0 }
   0x9   :  { %115 = shalt.err (!%p112_p2)
}
   0xa   :  { %s116_s23 = scalar_lea.vmem %s28_s13, 128  ;;  %p121_p4 = scmp.lt.s32.totalorder %s28_s13, %s28_s13 }
   0xb   :  { %p117_p3 = scmp.ne.s32.totalorder %s28_s13, %s116_s23  ;;  %p122_p5 = scmp.lt.s32.totalorder %s116_s23, %s116_s23 }
   0xd   :  { %p123_p6 = por %p122_p5, %p121_p4 }
   0xf   :  { %p124_p7 = pnand %p123_p6, %p117_p3 }
  0x11   :  { %127 = shalt.err (!%p124_p7)
}
  0x12   :  { %30 = dma.hbm_to_vmem [thread:$0]  %s273_s1, 128, %s28_s13, [#allocation6]  }
  0x13   :  { %s128_s28 = scalar_lea.hbm %s272_s0, 128 }
  0x14   :  { %p129_p8 = scmp.ne.s32.totalorder %s272_s0, %s128_s28  ;;  %p132_p9 = scmp.lt.u32.totalorder %s128_s28, %s272_s0 }
  0x16   :  { %p134_p10 = pnand %p132_p9, %p129_p8 }
  0x18   :  { %137 = shalt.err (!%p134_p10)
}
  0x19   :  { %s138_s6 = scalar_lea.vmem %s18_s15, 128  ;;  %p143_p12 = scmp.lt.s32.totalorder %s18_s15, %s18_s15 }
  0x1a   :  { %p139_p11 = scmp.ne.s32.totalorder %s18_s15, %s138_s6  ;;  %p144_p13 = scmp.lt.s32.totalorder %s138_s6, %s138_s6 }
  0x1c   :  { %p145_p0 = por %p144_p13, %p143_p12 }
  0x1e   :  { %p146_p1 = pnand %p145_p0, %p139_p11 }
  0x20   :  { %149 = shalt.err (!%p146_p1)
}
  0x21   :  { %20 = dma.hbm_to_vmem [thread:$0]  %s272_s0, 128, %s18_s15, [#allocation3]  }
  0x22   :  { %s202_s8 = smov [#allocation7]   ;;  %s150_s12 = scalar_lea.hbm %s274_s2, 128 }
  0x23   :  { %s37_s9 = sshll.u32 %s202_s8, 4  ;;  %p151_p2 = scmp.ne.s32.totalorder %s274_s2, %s150_s12  ;;  %s38_s9 = int_to_ptr.vmem [resolvable:$true] %s37_s9 }
  0x24   :  { %p154_p3 = scmp.lt.u32.totalorder %s150_s12, %s274_s2 }
  0x26   :  { %p156_p4 = pnand %p154_p3, %p151_p2 }
  0x28   :  { %159 = shalt.err (!%p156_p4)
}
  0x29   :  { %s160_s18 = scalar_lea.vmem %s38_s9, 128  ;;  %p165_p6 = scmp.lt.s32.totalorder %s38_s9, %s38_s9 }
  0x2a   :  { %p161_p5 = scmp.ne.s32.totalorder %s38_s9, %s160_s18  ;;  %p166_p7 = scmp.lt.s32.totalorder %s160_s18, %s160_s18 }
  0x2c   :  { %p167_p8 = por %p166_p7, %p165_p6 }
  0x2e   :  { %p168_p9 = pnand %p167_p8, %p161_p5 }
  0x30   :  { %171 = shalt.err (!%p168_p9)
}
  0x31   :  { %40 = dma.hbm_to_vmem [thread:$0]  %s274_s2, 128, %s38_s9, [#allocation6]  }
  0x32   :  { %194 = dma.done.wait [#allocation3], 128  }
  0x33   :  { %195 = vsyncadd [#allocation3], 4294967168 }
  0x34   :  { %196 = dma.done.wait [#allocation6], 256  }
  0x35   :  { %197 = vsyncadd [#allocation6], 4294967040  ;;  %v50_v0 = vld [vmem:[#allocation2] sm:$0xff]  ;;  %v51_v1 = vld [vmem:[#allocation5] sm:$0xff]  ;;  %vm58_vm0 = vcmask 261120   ;;  %vm71_vm1 = vcmask 7168  }
  0x36   :  { %v52_v2 = vld [vmem:[#allocation7] sm:$0xff]  ;;  %v53_v3 = vsub.f32 %v50_v0, %v51_v1  ;;  %s203_s2 = smov [#allocation8]  }
  0x37   :  { %v54_v4 = vsub.f32 %v50_v0, %v52_v2  ;;  %s90_s19 = sshll.u32 %s203_s2, 4  ;;  %s91_s19 = int_to_ptr.vmem [resolvable:$true] %s90_s19 }
  0x38   :  { %v55_v5 = vmul.f32 %v53_v3, %v53_v3  ;;  %s172_s21 = scalar_lea.vmem %s91_s19, 128  ;;  %p177_p11 = scmp.lt.s32.totalorder %s91_s19, %s91_s19 }
  0x39   :  { %v56_v6 = vmul.f32 %v54_v4, %v54_v4  ;;  %p173_p10 = scmp.ne.s32.totalorder %s91_s19, %s172_s21  ;;  %p178_p12 = scmp.lt.s32.totalorder %s172_s21, %s172_s21 }
  0x3b   :  { %v57_v7 = vsub.f32 %v55_v5, %v56_v6  ;;  %p179_p13 = por %p178_p12, %p177_p11 }
  0x3d   :  { %v59_v8 = vsel %vm58_vm0, %v57_v7, 0.0  ;;  %p180_p0 = pnand %p179_p13, %p173_p10 }
  0x3e   :  { %60 = vadd.xlane.f32.xlu0 %v59_v8 }
  0xcb   :  { %v61_v9 = vpop.xlane.xlu0 %60 }
  0xcc   :  { %v62_v10 = vadd.f32 1.0, %v61_v9 }
  0xce   :  { %v63_v11 = vmax.f32 %v62_v10, 0.0 }
  0xd0   :  { %v72_v12 = vsel %vm71_vm1, %v63_v11, 0.0 }
  0xd1   :  { %73 = vadd.xlane.f32.xlu0 %v72_v12 }
 0x15e   :  { %v74_v13 = vpop.xlane.xlu0 %73 }
 0x15f   :  { %v75_v14 = vrot.slane %v74_v13, 4 }
 0x161   :  { %v76_v15 = vadd.f32 %v75_v14, %v74_v13 }
 0x163   :  { %v77_v16 = vrot.slane %v76_v15, 2 }
 0x165   :  { %v78_v17 = vadd.f32 %v77_v16, %v76_v15 }
 0x167   :  { %v79_v18 = vrot.slane %v78_v17, 1 }
 0x169   :  { %v80_v19 = vadd.f32 %v79_v18, %v78_v17 }
 0x16b   :  { %100 = vpush %v80_v19 }
 0x19c   :  { %s101_s20 = spop %100 }
 0x19d   :  { %v82_v20 = vstv %s101_s20 }
 0x19e   :  { %83 = vst [vmem:[#allocation8] sm:$0xff] %v82_v20 }
 0x19f   :  { %183 = shalt.err (!%p180_p0)
}
 0x1a0   :  { %s184_s24 = scalar_lea.hbm %s275_s3, 128 }
 0x1a1   :  { %p185_p1 = scmp.ne.s32.totalorder %s275_s3, %s184_s24  ;;  %p188_p2 = scmp.lt.u32.totalorder %s184_s24, %s275_s3 }
 0x1a3   :  { %p190_p3 = pnand %p188_p2, %p185_p1 }
 0x1a5   :  { %193 = shalt.err (!%p190_p3)
}
 0x1a6   :  { %93 = dma.vmem_to_hbm [thread:$0]  %s91_s19, 128, %s275_s3, [#allocation4]  }
 0x1a7   :  { %198 = dma.done.wait [#allocation4], 128  }
 0x1a8   :  { %199 = vsyncadd [#allocation4], 4294967168 }
 0x1a9   :  { %97 = vsyncpa [#allocation3], 1 }
 0x1aa   :  { %98 = vsyncpa [#allocation6], 1 }
 0x1ab   :  { %99 = vsyncpa [#allocation4], 1 }

</bundles_post_ra>
